<compile_context>
chip_gen: v7x
topology: tpu7x:2x2x1
jax: 0.10.0
libtpu: 0.0.40
codegen_flags: <defaults>
</compile_context>

<pallas_src>
import functools

import jax
import jax.numpy as jnp
from jax.experimental import pallas as pl
from jax.experimental.pallas import tpu as pltpu


def _round_up(x, m):
    return ((x + m - 1) // m) * m


def _pad_rows(x, target_rows):
    pad = target_rows - x.shape[0]
    if pad == 0:
        return x
    return jnp.pad(x, ((0, pad), (0, 0)))


# ---------------------------------------------------------------------------
# Pallas kernels
# ---------------------------------------------------------------------------
def _predict_kernel(u_ref, i_ref, o_ref):
    # u_ref, i_ref: [TB, D]; o_ref: [1, TB] (lane-dense).
    prod = u_ref[...].astype(jnp.float32) * i_ref[...].astype(jnp.float32)
    ones = jnp.ones((1, prod.shape[1]), dtype=jnp.float32)
    # Row-reduce via the MXU so the result lands lane-dense as (1, TB)
    # (avoids a sublane->lane relayout and masked [TB,1] stores).
    o_ref[...] = jax.lax.dot_general(
        ones, prod,
        dimension_numbers=(((1,), (1,)), ((), ())),
        preferred_element_type=jnp.float32,
    )


def _rating_kernel(u_ref, it_ref, o_ref):
    # u_ref: [TB, D]; it_ref: [TM, D]; o_ref: [TB, TM].
    # Contract on the last dim of both operands (transposed-RHS) so no
    # explicit transpose is materialized; bf16 operands feed the MXU at full
    # rate, accumulation stays f32.
    u = u_ref[...].astype(jnp.bfloat16)
    it = it_ref[...].astype(jnp.bfloat16)
    o_ref[...] = jax.lax.dot_general(
        u, it,
        dimension_numbers=(((1,), (1,)), ((), ())),
        preferred_element_type=jnp.float32,
    )


def _bpr_loss_kernel(u_ref, p_ref, n_ref, o_ref, *, total_b, tile_b):
    # u_ref, p_ref, n_ref: [TB, D]; o_ref: [1, 1] resident accumulator.
    i = pl.program_id(0)

    @pl.when(i == 0)
    def _():
        o_ref[...] = jnp.zeros_like(o_ref)

    u = u_ref[...].astype(jnp.float32)
    pos = p_ref[...].astype(jnp.float32)
    neg = n_ref[...].astype(jnp.float32)
    diff = jnp.sum(u * (pos - neg), axis=-1, keepdims=True)        # [TB, 1]
    # Mask rows that are padding (global row index >= total_b).
    row = jax.lax.broadcasted_iota(jnp.int32, (tile_b, 1), 0) + i * tile_b
    valid = row < total_b
    # -log(sigmoid(diff)) = softplus(-diff), numerically stable form.
    loss = jnp.where(valid, jnp.logaddexp(0.0, -diff), 0.0)        # [TB, 1]
    o_ref[...] = o_ref[...] + jnp.sum(loss, axis=0, keepdims=True)

    @pl.when(i == pl.num_programs(0) - 1)
    def _():
        o_ref[...] = o_ref[...] / float(total_b)


# ---------------------------------------------------------------------------
# pallas_call wrappers
# ---------------------------------------------------------------------------
@jax.jit
def predict_scores(user_emb, item_emb):
    B, D = user_emb.shape
    TB = min(512, _round_up(B, 128))        # lane-dense output tile
    B_pad = _round_up(B, TB)
    user_emb = _pad_rows(user_emb, B_pad)
    item_emb = _pad_rows(item_emb, B_pad)

    out = pl.pallas_call(
        _predict_kernel,
        out_shape=jax.ShapeDtypeStruct((1, B_pad), jnp.float32),
        grid=(B_pad // TB,),
        in_specs=[
            pl.BlockSpec((TB, D), lambda i: (i, 0)),
            pl.BlockSpec((TB, D), lambda i: (i, 0)),
        ],
        out_specs=pl.BlockSpec((1, TB), lambda i: (0, i)),
        compiler_params=pltpu.CompilerParams(
            dimension_semantics=("parallel",)),
    )(user_emb, item_emb)
    return out[0, :B]                        # [B]


@jax.jit
def rating_scores(user_emb, all_item_emb):
    B, D = user_emb.shape
    M, _ = all_item_emb.shape
    TB = min(256, _round_up(B, 8))           # sublane-aligned user tile
    TM = min(512, _round_up(M, 128))         # lane-dense, MXU-filling item tile
    B_pad = _round_up(B, TB)
    M_pad = _round_up(M, TM)
    user_emb = _pad_rows(user_emb, B_pad)
    all_item_emb = _pad_rows(all_item_emb, M_pad)

    cost = pl.CostEstimate(
        flops=2 * B_pad * M_pad * D,
        transcendentals=0,
        bytes_accessed=(B_pad * D + M_pad * D + B_pad * M_pad) * 4,
    )
    out = pl.pallas_call(
        _rating_kernel,
        out_shape=jax.ShapeDtypeStruct((B_pad, M_pad), jnp.float32),
        grid=(B_pad // TB, M_pad // TM),
        in_specs=[
            pl.BlockSpec((TB, D), lambda i, j: (i, 0)),
            pl.BlockSpec((TM, D), lambda i, j: (j, 0)),
        ],
        out_specs=pl.BlockSpec((TB, TM), lambda i, j: (i, j)),
        compiler_params=pltpu.CompilerParams(
            dimension_semantics=("parallel", "parallel")),
        cost_estimate=cost,
    )(user_emb, all_item_emb)
    return out[:B, :M]                       # [B, M]


@jax.jit
def bpr_loss(user_emb, pos_emb, neg_emb):
    B, D = user_emb.shape
    TB = min(512, _round_up(B, 8))
    B_pad = _round_up(B, TB)
    user_emb = _pad_rows(user_emb, B_pad)
    pos_emb = _pad_rows(pos_emb, B_pad)
    neg_emb = _pad_rows(neg_emb, B_pad)

    kernel = functools.partial(_bpr_loss_kernel, total_b=B, tile_b=TB)
    out = pl.pallas_call(
        kernel,
        out_shape=jax.ShapeDtypeStruct((1, 1), jnp.float32),
        grid=(B_pad // TB,),
        in_specs=[
            pl.BlockSpec((TB, D), lambda i: (i, 0)),
            pl.BlockSpec((TB, D), lambda i: (i, 0)),
            pl.BlockSpec((TB, D), lambda i: (i, 0)),
        ],
        out_specs=pl.BlockSpec((1, 1), lambda i: (0, 0)),
        compiler_params=pltpu.CompilerParams(
            dimension_semantics=("arbitrary",)),   # reduction over B tiles
    )(user_emb, pos_emb, neg_emb)
    return out[0, 0]                         # scalar []


# ---------------------------------------------------------------------------
# Model (JAX-side glue: parameter init + embedding gathers)
# ---------------------------------------------------------------------------
class BasicModel:
    def __init__(self, num_users, num_items, embed_dim, key):
        self.num_users = num_users
        self.num_items = num_items
        self.embed_dim = embed_dim
        self._key = key
        self.reset_parameters()

    def reset_parameters(self):
        ku, ki = jax.random.split(self._key)
        scale = 0.1
        # Kept f32; embed_dim should be a multiple of 128 for lane-dense tiles.
        self.user_embedding = (
            scale * jax.random.normal(ku, (self.num_users, self.embed_dim))
        ).astype(jnp.float32)
        self.item_embedding = (
            scale * jax.random.normal(ki, (self.num_items, self.embed_dim))
        ).astype(jnp.float32)

    def forward(self):
        """Get the embeddings of the model."""
        return self.user_embedding, self.item_embedding

    def predict(self, users, items):
        """Scores between paired users/items, shape [batch_size]."""
        u_e = jnp.take(self.user_embedding, users, axis=0)
        i_e = jnp.take(self.item_embedding, items, axis=0)
        return predict_scores(u_e, i_e)

    def rating(self, users):
        """Scores between users and all candidate items, shape [B, num_items]."""
        u_e = jnp.take(self.user_embedding, users, axis=0)
        return rating_scores(u_e, self.item_embedding)

    def calculate_loss(self, user, pos_items, neg_items):
        """BPR training loss for a batch, shape []."""
        u_e = jnp.take(self.user_embedding, user, axis=0)
        p_e = jnp.take(self.item_embedding, pos_items, axis=0)
        n_e = jnp.take(self.item_embedding, neg_items, axis=0)
        return bpr_loss(u_e, p_e, n_e)


# ---------------------------------------------------------------------------
if __name__ == "__main__":
    key = jax.random.PRNGKey(0)
    k_model, k_u, k_p, k_n = jax.random.split(key, 4)

    # Small but layout-friendly shapes: embed_dim is a multiple of 128,
    # num_items/batch are deliberately NOT tile multiples to exercise padding.
    num_users, num_items, embed_dim, batch = 300, 500, 128, 10
    model = BasicModel(num_users, num_items, embed_dim, k_model)

    users = jax.random.randint(k_u, (batch,), 0, num_users)
    pos_items = jax.random.randint(k_p, (batch,), 0, num_items)
    neg_items = jax.random.randint(k_n, (batch,), 0, num_items)

    # Run the Pallas-backed paths.
    user_e, item_e = model.forward()
    scores = model.predict(users, pos_items)                   # [batch]
    ratings = model.rating(users)                              # [batch, num_items]
    loss = model.calculate_loss(users, pos_items, neg_items)   # []
    jax.block_until_ready((scores, ratings, loss))

    # Correctness checks against plain-JAX f32 references.
    u_e = jnp.take(model.user_embedding, users, axis=0)
    p_e = jnp.take(model.item_embedding, pos_items, axis=0)
    n_e = jnp.take(model.item_embedding, neg_items, axis=0)
    ref_scores = jnp.sum(u_e * p_e, axis=-1)
    ref_ratings = u_e @ model.item_embedding.T
    ref_loss = jnp.mean(
        jnp.logaddexp(0.0, -(ref_scores - jnp.sum(u_e * n_e, axis=-1))))

    assert user_e.shape == (num_users, embed_dim)
    assert item_e.shape == (num_items, embed_dim)
    assert scores.shape == (batch,)
    assert ratings.shape == (batch, num_items)
    assert loss.shape == ()
    # predict: f32 products, MXU row-reduce -> small accumulation-order noise.
    assert jnp.allclose(scores, ref_scores, atol=5e-3), "predict mismatch"
    # rating: bf16 MXU operands with f32 accumulate -> loosened tolerance.
    assert jnp.allclose(ratings, ref_ratings, atol=2e-2, rtol=2e-2), "rating mismatch"
    # loss: pure f32 VPU path -> tight tolerance.
    assert jnp.allclose(loss, ref_loss, atol=1e-5), "loss mismatch"

    print("KERNEL_OK")
</pallas_src>

<mosaic_0001>
module attributes {stable_mosaic.version = 11 : i64} {
  func.func @_predict_kernel(%arg0: i32, %arg1: memref<128x128xf32, #tpu.memory_space<vmem>>, %arg2: memref<128x128xf32, #tpu.memory_space<vmem>>, %arg3: memref<1x128xf32, #tpu.memory_space<vmem>>) attributes {dimension_semantics = [#tpu.dimension_semantics<parallel>], iteration_bounds = array<i64: 1>, scalar_prefetch = 0 : i64, scratch_operands = 0 : i64, tpu.core_type = #tpu.core_type<tc>, window_params = [{transform_indices = @transform_0, window_bounds = array<i64: 128, 128>}, {transform_indices = @transform_1, window_bounds = array<i64: 128, 128>}, {transform_indices = @transform_2, window_bounds = array<i64: 1, 128>}]} {
    %c0 = arith.constant 0 : index
    %c0_0 = arith.constant 0 : index
    %0 = vector.load %arg1[%c0, %c0_0] : memref<128x128xf32, #tpu.memory_space<vmem>>, vector<128x128xf32>
    %c0_1 = arith.constant 0 : index
    %c0_2 = arith.constant 0 : index
    %1 = vector.load %arg2[%c0_1, %c0_2] : memref<128x128xf32, #tpu.memory_space<vmem>>, vector<128x128xf32>
    %2 = arith.mulf %0, %1 : vector<128x128xf32>
    %cst = arith.constant 1.000000e+00 : f32
    %3 = vector.broadcast %cst : f32 to vector<1x128xf32>
    %cst_3 = arith.constant dense<0.000000e+00> : vector<1x128xf32>
    %4 = tpu.matmul %3, %2, %cst_3 {dimension_numbers = #tpu.dot_dimension_numbers<[1], [1], [0], [0], [0, 0, 1, 0], [], []>} : vector<1x128xf32>, vector<128x128xf32>, vector<1x128xf32> -> vector<1x128xf32>
    %c0_4 = arith.constant 0 : index
    %c0_5 = arith.constant 0 : index
    %5 = vector.load %arg3[%c0_4, %c0_5] : memref<1x128xf32, #tpu.memory_space<vmem>>, vector<1x128xf32>
    tpu.vector_store %arg3[%c0_4, %c0_5], %4 {strides = array<i32>} : memref<1x128xf32, #tpu.memory_space<vmem>>, vector<1x128xf32>,
    return
  }
  func.func @transform_0(%arg0: i32) -> (i32, i32) {
    %c0_i32 = arith.constant 0 : i32
    %c0_i32_0 = arith.constant 0 : i32
    return %arg0, %c0_i32 : i32, i32
  }
  func.func @transform_1(%arg0: i32) -> (i32, i32) {
    %c0_i32 = arith.constant 0 : i32
    %c0_i32_0 = arith.constant 0 : i32
    return %arg0, %c0_i32 : i32, i32
  }
  func.func @transform_2(%arg0: i32) -> (i32, i32) {
    %c0_i32 = arith.constant 0 : i32
    %c0_i32_0 = arith.constant 0 : i32
    return %c0_i32, %arg0 : i32, i32
  }
}

</mosaic_0001>

<bundles_post_ra>
// kernel: predict_scores.1
= control target key start
LH: loop header
LB: loop body
LE: loop exit
PB: predicated region body
PF: predicated region fallthrough
CT: control target
= control target key end

     0   :  { %v214_v0 = vmov 0.0|0.0   ;;  %vm215_vm0 = vmmov 0   ;;  %v216_v4 = vmov 0.0   ;;  %v217_v58 = vmov 1.0   ;;  %s340_s0 = inlined_call_operand.vmem [shape: f32[128,128], index: 0, kind: input, shape index: {}]   ;;  %s341_s1 = inlined_call_operand.vmem [shape: f32[128,128], index: 1, kind: input, shape index: {}]   ;;  %s342_s2 = inlined_call_operand.vmem [shape: f32[1,128], index: 2, kind: output, shape index: {}]  }
   0x1   :  { %186 = vmatprep.subr.bf16.mxu0 %v214_v0  ;;  %v11_v1 = vld [vmem:[%s340_s0] sm:$0xff]  ;;  %v12_v2 = vld [vmem:[%s340_s0 + $0x8] sm:$0xff]  ;;  %183 = vmatprep.mubr.msk.f32.mxu0 %vm215_vm0, %v216_v4  ;;  %v13_v8 = vld [vmem:[%s340_s0 + $0x10] sm:$0xff] }
   0x2   :  { %v27_v3 = vld [vmem:[%s341_s1] sm:$0xff]  ;;  %v28_v5 = vld [vmem:[%s341_s1 + $0x8] sm:$0xff]  ;;  %v14_v9 = vld [vmem:[%s340_s0 + $0x18] sm:$0xff] }
   0x3   :  { %v43_v6 = vmul.f32 %v27_v3, %v11_v1  ;;  %v44_v7 = vmul.f32 %v28_v5, %v12_v2  ;;  %v29_v10 = vld [vmem:[%s341_s1 + $0x10] sm:$0xff]  ;;  %v30_v11 = vld [vmem:[%s341_s1 + $0x18] sm:$0xff]  ;;  %v15_v16 = vld [vmem:[%s340_s0 + $0x20] sm:$0xff] }
   0x4   :  { %v45_v13 = vmul.f32 %v29_v10, %v13_v8  ;;  %v46_v14 = vmul.f32 %v30_v11, %v14_v9  ;;  %v16_v17 = vld [vmem:[%s340_s0 + $0x28] sm:$0xff]  ;;  %v31_v18 = vld [vmem:[%s341_s1 + $0x20] sm:$0xff]  ;;  %v17_v23 = vld [vmem:[%s340_s0 + $0x30] sm:$0xff] }
   0x5   :  { %v187_v12 = vpack.c.bf16 %v44_v7, %v43_v6  ;;  %v32_v19 = vld [vmem:[%s341_s1 + $0x28] sm:$0xff]  ;;  %v47_v20 = vmul.f32 %v31_v18, %v15_v16  ;;  %v18_v24 = vld [vmem:[%s340_s0 + $0x38] sm:$0xff]  ;;  %v33_v25 = vld [vmem:[%s341_s1 + $0x30] sm:$0xff] }
   0x6   :  { %v190_v15 = vpack.c.bf16 %v46_v14, %v45_v13  ;;  %v48_v21 = vmul.f32 %v32_v19, %v16_v17  ;;  %v34_v26 = vld [vmem:[%s341_s1 + $0x38] sm:$0xff]  ;;  %v49_v27 = vmul.f32 %v33_v25, %v17_v23  ;;  %v19_v30 = vld [vmem:[%s340_s0 + $0x40] sm:$0xff]  ;;  %v20_v31 = vld [vmem:[%s340_s0 + $0x48] sm:$0xff] }
   0x7   :  { %188 = vmatpush3.bf16.xpose.msra.mxu0 %v187_v12  ;;  %v50_v28 = vmul.f32 %v34_v26, %v18_v24  ;;  %v35_v32 = vld [vmem:[%s341_s1 + $0x40] sm:$0xff]  ;;  %v36_v33 = vld [vmem:[%s341_s1 + $0x48] sm:$0xff]  ;;  %v21_v37 = vld [vmem:[%s340_s0 + $0x50] sm:$0xff] }
   0x8   :  { %189 = vmatprep.subr.bf16.mxu0 %v214_v0  ;;  %v193_v22 = vpack.c.bf16 %v48_v21, %v47_v20  ;;  %v51_v34 = vmul.f32 %v35_v32, %v19_v30  ;;  %v52_v35 = vmul.f32 %v36_v33, %v20_v31  ;;  %v22_v38 = vld [vmem:[%s340_s0 + $0x58] sm:$0xff]  ;;  %v37_v39 = vld [vmem:[%s341_s1 + $0x50] sm:$0xff]  ;;  %v23_v44 = vld [vmem:[%s340_s0 + $0x60] sm:$0xff] }
   0x9   :  { %v196_v29 = vpack.c.bf16 %v50_v28, %v49_v27  ;;  %v38_v40 = vld [vmem:[%s341_s1 + $0x58] sm:$0xff]  ;;  %v53_v41 = vmul.f32 %v37_v39, %v21_v37  ;;  %v24_v45 = vld [vmem:[%s340_s0 + $0x68] sm:$0xff]  ;;  %v39_v46 = vld [vmem:[%s341_s1 + $0x60] sm:$0xff] }
   0xa   :  { %v199_v36 = vpack.c.bf16 %v52_v35, %v51_v34  ;;  %v54_v42 = vmul.f32 %v38_v40, %v22_v38  ;;  %v40_v47 = vld [vmem:[%s341_s1 + $0x68] sm:$0xff]  ;;  %v55_v48 = vmul.f32 %v39_v46, %v23_v44  ;;  %v25_v51 = vld [vmem:[%s340_s0 + $0x70] sm:$0xff]  ;;  %v26_v52 = vld [vmem:[%s340_s0 + $0x78] sm:$0xff] }
   0xb   :  { %v56_v49 = vmul.f32 %v40_v47, %v24_v45  ;;  %v41_v53 = vld [vmem:[%s341_s1 + $0x70] sm:$0xff]  ;;  %v42_v54 = vld [vmem:[%s341_s1 + $0x78] sm:$0xff] }
   0xc   :  { %v202_v43 = vpack.c.bf16 %v54_v42, %v53_v41  ;;  %v57_v55 = vmul.f32 %v41_v53, %v25_v51  ;;  %v58_v56 = vmul.f32 %v42_v54, %v26_v52 }
   0xd   :  { %v205_v50 = vpack.c.bf16 %v56_v49, %v55_v48 }
   0xe   :  { %v208_v57 = vpack.c.bf16 %v58_v56, %v57_v55 }
   0xf   :  { %191 = vmatpush3.bf16.xpose.msra.mxu0 %v190_v15 }
  0x10   :  { %192 = vmatprep.subr.bf16.mxu0 %v214_v0 }
  0x17   :  { %194 = vmatpush3.bf16.xpose.msra.mxu0 %v193_v22 }
  0x18   :  { %195 = vmatprep.subr.bf16.mxu0 %v214_v0 }
  0x1f   :  { %197 = vmatpush3.bf16.xpose.msra.mxu0 %v196_v29 }
  0x20   :  { %198 = vmatprep.subr.bf16.mxu0 %v214_v0 }
  0x27   :  { %200 = vmatpush3.bf16.xpose.msra.mxu0 %v199_v36 }
  0x28   :  { %201 = vmatprep.subr.bf16.mxu0 %v214_v0 }
  0x2f   :  { %203 = vmatpush3.bf16.xpose.msra.mxu0 %v202_v43 }
  0x30   :  { %204 = vmatprep.subr.bf16.mxu0 %v214_v0 }
  0x37   :  { %206 = vmatpush3.bf16.xpose.msra.mxu0 %v205_v50 }
  0x38   :  { %207 = vmatprep.subr.bf16.mxu0 %v214_v0 }
  0x3f   :  { %209 = vmatpush3.bf16.xpose.msra.mxu0 %v208_v57 }
  0x46   :  { %184 = vmatmul.mubr.f32.vlgmr.msra.gmra.mrb[0].mxu0 %v217_v58 }
 0x119   :  { %v125_v59 = vpop.f32.mrb[0].mxu0 }
 0x11a   :  { %129 = vst [vmem:[%s342_s2] sm:$0x1] %v125_v59  ;;  %v185_v60 = vpop.f32.mrb[1].mxu0 }

</bundles_post_ra>
